<compile_context>
chip_gen: v5e
topology: v5e:2x2
jax: 0.10.0
libtpu: 0.0.40
codegen_flags: <defaults>
</compile_context>

<pallas_src>
import math

import jax
import jax.numpy as jnp
from jax.experimental import pallas as pl
from jax.experimental.pallas import tpu as pltpu

_LANES = 128
_MIN_GRID_STEPS = 8  # so v7x's two TensorCores both get work


def _round_up(x: int, m: int) -> int:
    return ((x + m - 1) // m) * m


def _sublanes_for(dtype) -> int:
    # f32 -> 8, bf16 -> 16, int8/fp8 -> 32 (sub-32-bit dtypes pack along sublanes).
    itemsize = jnp.dtype(dtype).itemsize
    return max(8, 32 // max(1, itemsize))


def _target_block_bytes() -> int:
    # Re-derive the per-block budget per TPU generation (v7x has only 64 MiB
    # physical VMEM per TensorCore; v5e/v6e have 128 MiB).
    try:
        vmem = int(pltpu.get_tpu_info().vmem_capacity_bytes)
    except Exception:
        vmem = 64 * 1024 * 1024  # conservative (v7x-sized) default
    if vmem >= 96 * 1024 * 1024:
        return 12 * 1024 * 1024  # v5e / v6e
    return 8 * 1024 * 1024       # v7x: 2x8 MiB double-buffered + headroom < 32 MiB scoped


def _fill_rows_kernel(pattern_ref, o_ref):
    # pattern_ref: (1, W) block, constant index_map -> VMEM-resident across grid.
    # o_ref:       (tile_rows, W) output slab owned by this grid step.
    # Sublane-broadcast of a single row; hidden under the HBM store of the block.
    o_ref[...] = jnp.broadcast_to(pattern_ref[...], o_ref.shape)


def _fill_rows(pattern: jax.Array, n_rows: int) -> jax.Array:
    """Return an exact (n_rows, W) array whose every row equals pattern[0]."""
    _, width = pattern.shape
    dtype = pattern.dtype
    itemsize = jnp.dtype(dtype).itemsize
    row_bytes = width * itemsize
    sublane = _sublanes_for(dtype)

    # Largest sublane-aligned tile under the per-generation block budget.
    budget_rows = max(sublane, (_target_block_bytes() // row_bytes) // sublane * sublane)
    # Aim for >= _MIN_GRID_STEPS grid steps so the "parallel" axis can be
    # sharded across v7x's two TensorCores (no effect on single-TC v5e/v6e).
    rows_for_min_steps = _round_up(pl.cdiv(n_rows, _MIN_GRID_STEPS), sublane)
    tile_rows = min(budget_rows, rows_for_min_steps)
    if n_rows >= sublane:
        # Keep the block inside the array along rows (last block is masked).
        tile_rows = max(sublane, min(tile_rows, (n_rows // sublane) * sublane))
    else:
        tile_rows = n_rows  # full-extent block for tiny outputs

    grid = (pl.cdiv(n_rows, tile_rows),)
    block_bytes = tile_rows * row_bytes
    # Double-buffered output + (small) pattern input + headroom.
    vmem_limit = 2 * block_bytes + 2 * row_bytes + (8 << 20)

    return pl.pallas_call(
        _fill_rows_kernel,
        out_shape=jax.ShapeDtypeStruct((n_rows, width), dtype),
        grid_spec=pltpu.PrefetchScalarGridSpec(
            num_scalar_prefetch=0,
            grid=grid,
            # Constant block index -> (1, W) pattern stays VMEM-resident.
            in_specs=[pl.BlockSpec((1, width), lambda i: (0, 0))],
            # Each grid step owns one large output slab; tail rows are masked.
            out_specs=pl.BlockSpec((tile_rows, width), lambda i: (i, 0)),
        ),
        compiler_params=pltpu.CompilerParams(
            dimension_semantics=("parallel",),
            vmem_limit_bytes=vmem_limit,
        ),
        cost_estimate=pl.CostEstimate(
            flops=0,
            transcendentals=0,
            bytes_accessed=n_rows * row_bytes + row_bytes,
        ),
    )(pattern)


def dummy_node_encoder(x: jax.Array, weight: jax.Array) -> jax.Array:
    """Pallas equivalent of DummyNodeEncoder.forward.

    x: any-shaped integer array (values ignored, matching the zeros_like lookup).
    weight: (1, H) embedding table.
    returns: x.shape + (H,) array of weight's dtype, every position == weight[0].
    """
    H = weight.shape[-1]
    weight2d = weight.reshape(1, H)
    lead_shape = tuple(x.shape)
    n_positions = int(math.prod(lead_shape)) if lead_shape else 1
    out_shape = lead_shape + (H,)
    total = n_positions * H

    if total == 0:
        # Zero-sized input: no kernel launch needed.
        return jnp.zeros(out_shape, dtype=weight.dtype)

    # Lane-dense packing width: W = lcm(H, 128).  Row-major flattening of
    # x.shape + (H,) viewed as (total // W, W) has identical rows (each is the
    # weight row tiled W // H times), so all stores are full 128-lane vst.
    W = H * (_LANES // math.gcd(H, _LANES))
    if total % W == 0:
        reps = W // H
        pattern = jnp.tile(weight2d, (1, reps)) if reps > 1 else weight2d
        out = _fill_rows(pattern, total // W)           # exact size, no padding
        return out.reshape(out_shape)                   # metadata-only reshape

    # Exact-shape fallback (total not a multiple of lcm(H, 128)): one row per
    # position, width H.  No padding / slicing — Pallas masks the tail block.
    out = _fill_rows(weight2d, n_positions)
    return out.reshape(out_shape)


if __name__ == "__main__":
    key = jax.random.PRNGKey(0)
    k_w, k_x = jax.random.split(key)

    # Case 1: hidden_dim divides 128 -> lane-dense (R, 128) path.
    H1 = 32
    w1 = jax.random.normal(k_w, (1, H1), dtype=jnp.float32)
    x1 = jax.random.randint(k_x, (2, 8), 0, 100, dtype=jnp.int32)
    out1 = jax.block_until_ready(dummy_node_encoder(x1, w1))
    ref1 = jnp.broadcast_to(w1[0], x1.shape + (H1,))
    assert out1.shape == (2, 8, H1) and out1.dtype == jnp.float32
    assert jnp.allclose(out1, ref1), "mismatch (lane-dense, W=128)"

    # Case 2: 128 % H != 0 -> lcm-packed lane-dense path (W = 384).
    H2 = 48
    w2 = jax.random.normal(k_w, (1, H2), dtype=jnp.float32)
    out2 = jax.block_until_ready(dummy_node_encoder(x1, w2))
    ref2 = jnp.broadcast_to(w2[0], x1.shape + (H2,))
    assert jnp.allclose(out2, ref2), "mismatch (lcm-packed, W=384)"

    # Case 3: total not a multiple of lcm(H,128) -> exact-shape fallback.
    x3 = jax.random.randint(k_x, (2, 3), 0, 100, dtype=jnp.int32)
    out3 = jax.block_until_ready(dummy_node_encoder(x3, w2))
    ref3 = jnp.broadcast_to(w2[0], x3.shape + (H2,))
    assert jnp.allclose(out3, ref3), "mismatch (exact-shape fallback)"

    # Case 4: multi-step grid (exercises the parallel axis / tail masking).
    x4 = jax.random.randint(k_x, (8, 64), 0, 100, dtype=jnp.int32)
    out4 = jax.block_until_ready(dummy_node_encoder(x4, w1))
    ref4 = jnp.broadcast_to(w1[0], x4.shape + (H1,))
    assert jnp.allclose(out4, ref4), "mismatch (multi-step grid)"

    print("KERNEL_OK")
</pallas_src>

<mosaic_0001>
module attributes {stable_mosaic.version = 11 : i64} {
  func.func @_fill_rows_kernel(%arg0: i32, %arg1: memref<1x128xf32, #tpu.memory_space<vmem>>, %arg2: memref<4x128xf32, #tpu.memory_space<vmem>>) attributes {dimension_semantics = [#tpu.dimension_semantics<parallel>], iteration_bounds = array<i64: 1>, scalar_prefetch = 0 : i64, scratch_operands = 0 : i64, tpu.core_type = #tpu.core_type<tc>, window_params = [{pipeline_mode = #tpu.pipeline_mode<synchronous>, transform_indices = @transform_0, window_bounds = array<i64: 1, 128>}, {transform_indices = @transform_1, window_bounds = array<i64: 4, 128>}]} {
    %c0 = arith.constant 0 : index
    %c0_0 = arith.constant 0 : index
    %0 = vector.load %arg1[%c0, %c0_0] : memref<1x128xf32, #tpu.memory_space<vmem>>, vector<1x128xf32>
    %1 = vector.shape_cast %0 : vector<1x128xf32> to vector<1x128xf32>
    %2 = vector.broadcast %1 : vector<1x128xf32> to vector<4x128xf32>
    %c0_1 = arith.constant 0 : index
    %c0_2 = arith.constant 0 : index
    %3 = vector.load %arg2[%c0_1, %c0_2] : memref<4x128xf32, #tpu.memory_space<vmem>>, vector<4x128xf32>
    tpu.vector_store %arg2[%c0_1, %c0_2], %2 {strides = array<i32>} : memref<4x128xf32, #tpu.memory_space<vmem>>, vector<4x128xf32>,
    return
  }
  func.func @transform_0(%arg0: i32) -> (i32, i32) {
    %c0_i32 = arith.constant 0 : i32
    %c0_i32_0 = arith.constant 0 : i32
    %c0_i32_1 = arith.constant 0 : i32
    return %c0_i32, %c0_i32_0 : i32, i32
  }
  func.func @transform_1(%arg0: i32) -> (i32, i32) {
    %c0_i32 = arith.constant 0 : i32
    %c0_i32_0 = arith.constant 0 : i32
    return %arg0, %c0_i32 : i32, i32
  }
}

</mosaic_0001>

<bundles_post_ra>
// kernel: tpu_custom_call.1
= control target key start
LH: loop header
LB: loop body
LE: loop exit
PB: predicated region body
PF: predicated region fallthrough
CT: control target
= control target key end

     0   :  { %6 = vsyncpa [#allocation3], 0  ;;  %s118_s0 = inlined_call_operand.hbm [shape: f32[1,128], index: 0, kind: input, shape index: {}]   ;;  %s119_s1 = inlined_call_operand.hbm [shape: f32[4,128], index: 1, kind: output, shape index: {}]  }
   0x1   :  { %7 = vsyncpa [#allocation4], 0  ;;  %s13_s8 = sshll.u32 %s118_s0, 4  ;;  %s100_s9 = smov [#allocation2]   ;;  %s14_s8 = int_to_ptr.hbm [resolvable:$true] %s13_s8 }
   0x2   :  { %s15_s10 = sshll.u32 %s100_s9, 4  ;;  %s16_s10 = int_to_ptr.vmem [resolvable:$true] %s15_s10 }
   0x3   :  { %18 = dma.hbm_to_vmem [thread:$0]  %s14_s8, 16, %s16_s10, [#allocation3]  }
   0x4   :  { %96 = dma.done.wait [#allocation3], 16  }
   0x5   :  { %97 = vsyncadd [#allocation3], 4294967280  ;;  %s101_s11 = smov [#allocation5]   ;;  %s35_s15 = sshll.u32 %s119_s1, 4  ;;  %v47_v0 = vld [vmem:[#allocation2] ss:$0 sm:$0xff]  ;;  %s36_s15 = int_to_ptr.hbm [resolvable:$true] %s35_s15 }
   0x6   :  { %s33_s12 = sshll.u32 %s101_s11, 4  ;;  %27 = vst [vmem:[#allocation5] sm:$0xf] %v47_v0  ;;  %s34_s12 = int_to_ptr.vmem [resolvable:$true] %s33_s12 }
   0x7   :  { %38 = dma.vmem_to_hbm [thread:$0]  %s34_s12, 64, %s36_s15, [#allocation4]  }
   0x8   :  { %98 = dma.done.wait [#allocation4], 64  }
   0x9   :  { %99 = vsyncadd [#allocation4], 4294967232 }
   0xa   :  { %43 = vsyncpa [#allocation3], 1 }
   0xb   :  { %44 = vsyncpa [#allocation4], 1 }

</bundles_post_ra>
